<compile_context>
chip_gen: v7x
topology: tpu7x:2x2x1
jax: 0.10.0
libtpu: 0.0.40
codegen_flags: <defaults>
</compile_context>

<pallas_src>
import functools

import jax
import jax.numpy as jnp
from jax.experimental import pallas as pl
from jax.experimental.pallas import tpu as pltpu

LN_EPS = 1e-5  # PyTorch nn.LayerNorm default


def _round_up(x, m):
    return ((x + m - 1) // m) * m


# ----------------------------------------------------------------------------
# Kernel
# ----------------------------------------------------------------------------
def ffn_kernel(x_ref, gamma_ref, beta_ref, w1_ref, b1_ref, w2_ref, b2_ref,
               o_ref, xn_ref, acc_ref):
    # x_ref: (tt, D); w1_ref: (D, th); w2_ref: (th, D); o_ref: (tt, D)
    j = pl.program_id(1)

    # ---- per token-tile setup (only on the first hidden chunk) ----
    @pl.when(j == 0)
    def _():
        x = x_ref[...].astype(jnp.float32)
        mean = jnp.mean(x, axis=-1, keepdims=True)
        centered = x - mean
        var = jnp.mean(centered * centered, axis=-1, keepdims=True)
        xn = centered * jax.lax.rsqrt(var + LN_EPS)
        xn = xn * gamma_ref[...].astype(jnp.float32) + beta_ref[...].astype(jnp.float32)
        xn_ref[...] = xn.astype(xn_ref.dtype)
        # Initialize the accumulator with the second bias (added exactly once).
        acc_ref[...] = jnp.broadcast_to(
            b2_ref[...].astype(jnp.float32), acc_ref.shape)

    # ---- Linear(dim -> hidden chunk) ----
    h = jnp.dot(xn_ref[...], w1_ref[...], preferred_element_type=jnp.float32)
    h = h + b1_ref[...].astype(jnp.float32)

    # ---- GELU (exact erf — PyTorch nn.GELU default) ----
    h = 0.5 * h * (1.0 + jax.lax.erf(h * jnp.float32(0.7071067811865476)))

    # Dropout(p=0.0) is the identity -> no-op.

    # ---- Linear(hidden chunk -> dim), accumulate in f32 VMEM scratch ----
    acc_ref[...] += jnp.dot(h.astype(w2_ref.dtype), w2_ref[...],
                            preferred_element_type=jnp.float32)

    # ---- write out on the last hidden chunk ----
    @pl.when(j == pl.num_programs(1) - 1)
    def _():
        o_ref[...] = acc_ref[...].astype(o_ref.dtype)


# ----------------------------------------------------------------------------
# Generation-aware defaults / VMEM budgeting
# ----------------------------------------------------------------------------
def _tpu_defaults():
    """Returns (tile_tokens, tile_h, vmem_limit_bytes) based on the chip."""
    cap = None
    try:
        info = pltpu.get_tpu_info()
        cap = int(getattr(info, "vmem_capacity_bytes", 0) or 0) or None
    except Exception:
        cap = None
    if cap is None:
        cap = 64 * 1024 * 1024  # conservative: v7x per-TensorCore VMEM
    vmem_limit = (cap * 3) // 4  # leave headroom for compiler-internal scratch
    # 128 MiB parts (v5e/v6e): large token tile crosses the HBM ridge for the
    # re-streamed weights; 64 MiB parts (v7x): 512 tokens is already compute-bound.
    tile_tokens = 1024 if cap >= 100 * 1024 * 1024 else 512
    return tile_tokens, 512, vmem_limit


def _est_vmem_bytes(tt, th, d, x_b, w_b, o_b, c_b):
    """Rough VMEM footprint: double-buffered blocks + resident scratch."""
    blocks = 2 * (tt * d * x_b        # x tile
                  + d * th * w_b      # w1 chunk
                  + th * d * w_b      # w2 chunk
                  + tt * d * o_b      # output tile
                  + 2 * d * 4         # gamma, beta
                  + th * 4 + d * 4)   # b1 chunk, b2
    scratch = tt * d * (c_b + 4)      # cached LayerNorm output + f32 accumulator
    return blocks + scratch


# ----------------------------------------------------------------------------
# Wrapper
# ----------------------------------------------------------------------------
@functools.partial(jax.jit, static_argnames=("tt", "th", "vmem_limit_bytes"))
def _ffn_impl(x, gamma, beta, w1, b1, w2, b2, *, tt, th, vmem_limit_bytes):
    B, S, D = x.shape
    H = w1.shape[1]
    N = B * S

    # Matmul-input dtype follows the weights (bf16 weights -> bf16 MXU path).
    compute_dtype = w1.dtype

    Np = _round_up(N, tt)
    Hp = _round_up(H, th)

    x2d = x.reshape(N, D)
    if Np != N:
        x2d = jnp.pad(x2d, ((0, Np - N), (0, 0)))

    # Zero-pad the hidden dimension: padded units contribute exactly 0
    # (h = 0 -> GELU(0) = 0 -> 0 @ w2), so numerics are unchanged.
    if Hp != H:
        w1 = jnp.pad(w1, ((0, 0), (0, Hp - H)))
        b1 = jnp.pad(b1, ((0, Hp - H),))
        w2 = jnp.pad(w2, ((0, Hp - H), (0, 0)))

    gamma2d = gamma.reshape(1, D)
    beta2d = beta.reshape(1, D)
    b1_2d = b1.reshape(1, Hp)
    b2_2d = b2.reshape(1, D)

    grid = (Np // tt, Hp // th)

    out = pl.pallas_call(
        ffn_kernel,
        out_shape=jax.ShapeDtypeStruct((Np, D), x.dtype),
        grid_spec=pltpu.PrefetchScalarGridSpec(
            num_scalar_prefetch=0,
            grid=grid,
            in_specs=[
                pl.BlockSpec((tt, D), lambda i, j: (i, 0)),   # x tile
                pl.BlockSpec((1, D), lambda i, j: (0, 0)),    # gamma
                pl.BlockSpec((1, D), lambda i, j: (0, 0)),    # beta
                pl.BlockSpec((D, th), lambda i, j: (0, j)),   # w1 chunk
                pl.BlockSpec((1, th), lambda i, j: (0, j)),   # b1 chunk
                pl.BlockSpec((th, D), lambda i, j: (j, 0)),   # w2 chunk
                pl.BlockSpec((1, D), lambda i, j: (0, 0)),    # b2
            ],
            out_specs=pl.BlockSpec((tt, D), lambda i, j: (i, 0)),
            scratch_shapes=[
                pltpu.VMEM((tt, D), compute_dtype),   # cached LayerNorm output
                pltpu.VMEM((tt, D), jnp.float32),     # f32 accumulator
            ],
        ),
        compiler_params=pltpu.CompilerParams(
            dimension_semantics=("parallel", "arbitrary"),
            vmem_limit_bytes=vmem_limit_bytes,
        ),
    )(x2d, gamma2d, beta2d, w1, b1_2d, w2, b2_2d)

    return out[:N].reshape(B, S, D)


def feed_forward(x, gamma, beta, w1, b1, w2, b2, *,
                 tile_tokens=None, tile_h=None, vmem_limit_bytes=None):
    """x: (batch, seq, dim) -> (batch, seq, dim)."""
    B, S, D = x.shape
    H = w1.shape[1]
    N = B * S

    def_tt, def_th, def_vmem = _tpu_defaults()
    tile_tokens = def_tt if tile_tokens is None else tile_tokens
    tile_h = def_th if tile_h is None else tile_h
    vmem_limit_bytes = def_vmem if vmem_limit_bytes is None else vmem_limit_bytes

    # Token tile: clamp to the problem, keep sublane-aligned (16 covers f32/bf16).
    tt = min(tile_tokens, _round_up(N, 16))
    tt = _round_up(tt, 16)

    # Guarantee >=2 token tiles when the problem allows, so the "parallel"
    # token axis can shard across the 2 TensorCores of a v7x chip.
    if N >= 32 and _round_up(N, tt) // tt < 2:
        tt = max(16, _round_up((N + 1) // 2, 16))

    # Hidden chunk: multiple of 128 lanes, never larger than the padded H.
    th = min(tile_h, _round_up(H, 128))
    th = max(128, (th // 128) * 128)

    # Shrink to fit the VMEM budget: hidden chunk first (only pipeline
    # granularity), token tile last (it sets the weight-stream intensity).
    x_b = jnp.dtype(x.dtype).itemsize
    w_b = jnp.dtype(w1.dtype).itemsize
    budget = int(vmem_limit_bytes * 0.85)
    while _est_vmem_bytes(tt, th, D, x_b, w_b, x_b, w_b) > budget:
        if th > 128:
            th = max(128, (th // 2 // 128) * 128)
        elif tt > 32:
            tt = max(16, _round_up(tt // 2, 16))
        else:
            break

    return _ffn_impl(x, gamma, beta, w1, b1, w2, b2,
                     tt=int(tt), th=int(th),
                     vmem_limit_bytes=int(vmem_limit_bytes))


# ----------------------------------------------------------------------------
# Reference + demo
# ----------------------------------------------------------------------------
def reference_ffn(x, gamma, beta, w1, b1, w2, b2):
    xf = x.astype(jnp.float32)
    mean = jnp.mean(xf, axis=-1, keepdims=True)
    var = jnp.mean((xf - mean) ** 2, axis=-1, keepdims=True)
    xn = (xf - mean) * jax.lax.rsqrt(var + LN_EPS) * gamma + beta
    h = xn @ w1 + b1
    h = 0.5 * h * (1.0 + jax.lax.erf(h / jnp.sqrt(2.0)))
    y = h @ w2 + b2
    return y.astype(x.dtype)


if __name__ == "__main__":
    # Small shapes consistent with the module: (batch, seq, dim), hidden dim.
    batch, seq, dim, hidden = 2, 8, 32, 64

    key = jax.random.PRNGKey(0)
    kx, kw1, kb1, kw2, kb2 = jax.random.split(key, 5)

    x = jax.random.normal(kx, (batch, seq, dim), dtype=jnp.float32)

    gamma = jnp.ones((dim,), jnp.float32)
    beta = jnp.zeros((dim,), jnp.float32)
    w1 = jax.random.normal(kw1, (dim, hidden), jnp.float32) * 0.02
    b1 = jax.random.normal(kb1, (hidden,), jnp.float32) * 0.01
    w2 = jax.random.normal(kw2, (hidden, dim), jnp.float32) * 0.02
    b2 = jax.random.normal(kb2, (dim,), jnp.float32) * 0.01

    y = feed_forward(x, gamma, beta, w1, b1, w2, b2)
    jax.block_until_ready(y)

    y_ref = reference_ffn(x, gamma, beta, w1, b1, w2, b2)
    assert jnp.allclose(y, y_ref, atol=1e-4, rtol=1e-4), "mismatch vs reference"

    print("KERNEL_OK")
</pallas_src>

<mosaic_0001>
module attributes {stable_mosaic.version = 11 : i64} {
  func.func @ffn_kernel(%arg0: i32, %arg1: i32, %arg2: memref<16x32xf32, #tpu.memory_space<vmem>>, %arg3: memref<1x32xf32, #tpu.memory_space<vmem>>, %arg4: memref<1x32xf32, #tpu.memory_space<vmem>>, %arg5: memref<32x128xf32, #tpu.memory_space<vmem>>, %arg6: memref<1x128xf32, #tpu.memory_space<vmem>>, %arg7: memref<128x32xf32, #tpu.memory_space<vmem>>, %arg8: memref<1x32xf32, #tpu.memory_space<vmem>>, %arg9: memref<16x32xf32, #tpu.memory_space<vmem>>, %arg10: memref<16x32xf32, #tpu.memory_space<vmem>>, %arg11: memref<16x32xf32, #tpu.memory_space<vmem>>) attributes {dimension_semantics = [#tpu.dimension_semantics<parallel>, #tpu.dimension_semantics<arbitrary>], iteration_bounds = array<i64: 1, 1>, scalar_prefetch = 0 : i64, scratch_operands = 2 : i64, tpu.core_type = #tpu.core_type<tc>, window_params = [{transform_indices = @transform_0, window_bounds = array<i64: 16, 32>}, {pipeline_mode = #tpu.pipeline_mode<synchronous>, transform_indices = @transform_1, window_bounds = array<i64: 1, 32>}, {pipeline_mode = #tpu.pipeline_mode<synchronous>, transform_indices = @transform_2, window_bounds = array<i64: 1, 32>}, {transform_indices = @transform_3, window_bounds = array<i64: 32, 128>}, {transform_indices = @transform_4, window_bounds = array<i64: 1, 128>}, {transform_indices = @transform_5, window_bounds = array<i64: 128, 32>}, {pipeline_mode = #tpu.pipeline_mode<synchronous>, transform_indices = @transform_6, window_bounds = array<i64: 1, 32>}, {transform_indices = @transform_7, window_bounds = array<i64: 16, 32>}]} {
    %c0_i32 = arith.constant 0 : i32
    %0 = arith.cmpi eq, %arg1, %c0_i32 : i32
    %1 = arith.extui %0 : i1 to i32
    %c0_i32_0 = arith.constant 0 : i32
    %2 = arith.cmpi ne, %1, %c0_i32_0 : i32
    scf.if %2 {
      %c0_18 = arith.constant 0 : index
      %c0_19 = arith.constant 0 : index
      %25 = vector.load %arg2[%c0_18, %c0_19] : memref<16x32xf32, #tpu.memory_space<vmem>>, vector<16x32xf32>
      %cst_20 = arith.constant dense<0.000000e+00> : vector<16xf32>
      %26 = vector.multi_reduction <add>, %25, %cst_20 [1] : vector<16x32xf32> to vector<16xf32>
      %27 = vector.shape_cast %26 : vector<16xf32> to vector<16x1xf32>
      %cst_21 = arith.constant 3.200000e+01 : f32
      %28 = vector.broadcast %cst_21 : f32 to vector<16x1xf32>
      %29 = arith.divf %27, %28 : vector<16x1xf32>
      %30 = vector.broadcast %29 : vector<16x1xf32> to vector<16x32xf32>
      %31 = arith.subf %25, %30 : vector<16x32xf32>
      %32 = arith.mulf %31, %31 : vector<16x32xf32>
      %cst_22 = arith.constant dense<0.000000e+00> : vector<16xf32>
      %33 = vector.multi_reduction <add>, %32, %cst_22 [1] : vector<16x32xf32> to vector<16xf32>
      %34 = vector.shape_cast %33 : vector<16xf32> to vector<16x1xf32>
      %cst_23 = arith.constant 3.200000e+01 : f32
      %35 = vector.broadcast %cst_23 : f32 to vector<16x1xf32>
      %36 = arith.divf %34, %35 : vector<16x1xf32>
      %cst_24 = arith.constant 9.99999974E-6 : f32
      %37 = vector.broadcast %cst_24 : f32 to vector<16x1xf32>
      %38 = arith.addf %36, %37 : vector<16x1xf32>
      %39 = math.rsqrt %38 : vector<16x1xf32>
      %40 = vector.broadcast %39 : vector<16x1xf32> to vector<16x32xf32>
      %41 = arith.mulf %31, %40 : vector<16x32xf32>
      %c0_25 = arith.constant 0 : index
      %c0_26 = arith.constant 0 : index
      %42 = vector.load %arg3[%c0_25, %c0_26] : memref<1x32xf32, #tpu.memory_space<vmem>>, vector<1x32xf32>
      %43 = vector.broadcast %42 : vector<1x32xf32> to vector<16x32xf32>
      %44 = arith.mulf %41, %43 : vector<16x32xf32>
      %c0_27 = arith.constant 0 : index
      %c0_28 = arith.constant 0 : index
      %45 = vector.load %arg4[%c0_27, %c0_28] : memref<1x32xf32, #tpu.memory_space<vmem>>, vector<1x32xf32>
      %46 = vector.broadcast %45 : vector<1x32xf32> to vector<16x32xf32>
      %47 = arith.addf %44, %46 : vector<16x32xf32>
      %c0_29 = arith.constant 0 : index
      %c0_30 = arith.constant 0 : index
      %48 = vector.load %arg10[%c0_29, %c0_30] : memref<16x32xf32, #tpu.memory_space<vmem>>, vector<16x32xf32>
      tpu.vector_store %arg10[%c0_29, %c0_30], %47 {strides = array<i32>} : memref<16x32xf32, #tpu.memory_space<vmem>>, vector<16x32xf32>,
      %c0_31 = arith.constant 0 : index
      %c0_32 = arith.constant 0 : index
      %49 = vector.load %arg8[%c0_31, %c0_32] : memref<1x32xf32, #tpu.memory_space<vmem>>, vector<1x32xf32>
      %50 = vector.shape_cast %49 : vector<1x32xf32> to vector<1x32xf32>
      %51 = vector.broadcast %50 : vector<1x32xf32> to vector<16x32xf32>
      %c0_33 = arith.constant 0 : index
      %c0_34 = arith.constant 0 : index
      %52 = vector.load %arg11[%c0_33, %c0_34] : memref<16x32xf32, #tpu.memory_space<vmem>>, vector<16x32xf32>
      tpu.vector_store %arg11[%c0_33, %c0_34], %51 {strides = array<i32>} : memref<16x32xf32, #tpu.memory_space<vmem>>, vector<16x32xf32>,
    } else {
    }
    %c0 = arith.constant 0 : index
    %c0_1 = arith.constant 0 : index
    %3 = vector.load %arg10[%c0, %c0_1] : memref<16x32xf32, #tpu.memory_space<vmem>>, vector<16x32xf32>
    %c0_2 = arith.constant 0 : index
    %c0_3 = arith.constant 0 : index
    %4 = vector.load %arg5[%c0_2, %c0_3] : memref<32x128xf32, #tpu.memory_space<vmem>>, vector<32x128xf32>
    %cst = arith.constant dense<0.000000e+00> : vector<16x128xf32>
    %5 = tpu.matmul %3, %4, %cst {dimension_numbers = #tpu.dot_dimension_numbers<[1], [0], [0], [1], [0, 0, 1, 1], [], []>} : vector<16x32xf32>, vector<32x128xf32>, vector<16x128xf32> -> vector<16x128xf32>
    %c0_4 = arith.constant 0 : index
    %c0_5 = arith.constant 0 : index
    %6 = vector.load %arg6[%c0_4, %c0_5] : memref<1x128xf32, #tpu.memory_space<vmem>>, vector<1x128xf32>
    %7 = vector.broadcast %6 : vector<1x128xf32> to vector<16x128xf32>
    %8 = arith.addf %5, %7 : vector<16x128xf32>
    %cst_6 = arith.constant 5.000000e-01 : f32
    %9 = vector.broadcast %cst_6 : f32 to vector<16x128xf32>
    %10 = arith.mulf %9, %8 : vector<16x128xf32>
    %cst_7 = arith.constant 0.707106769 : f32
    %11 = vector.broadcast %cst_7 : f32 to vector<16x128xf32>
    %12 = arith.mulf %8, %11 : vector<16x128xf32>
    %13 = math.erf %12 : vector<16x128xf32>
    %cst_8 = arith.constant 1.000000e+00 : f32
    %14 = vector.broadcast %cst_8 : f32 to vector<16x128xf32>
    %15 = arith.addf %14, %13 : vector<16x128xf32>
    %16 = arith.mulf %10, %15 : vector<16x128xf32>
    %c0_9 = arith.constant 0 : index
    %c0_10 = arith.constant 0 : index
    %17 = vector.load %arg11[%c0_9, %c0_10] : memref<16x32xf32, #tpu.memory_space<vmem>>, vector<16x32xf32>
    %c0_11 = arith.constant 0 : index
    %c0_12 = arith.constant 0 : index
    %18 = vector.load %arg7[%c0_11, %c0_12] : memref<128x32xf32, #tpu.memory_space<vmem>>, vector<128x32xf32>
    %cst_13 = arith.constant dense<0.000000e+00> : vector<16x32xf32>
    %19 = tpu.matmul %16, %18, %cst_13 {dimension_numbers = #tpu.dot_dimension_numbers<[1], [0], [0], [1], [0, 0, 1, 1], [], []>} : vector<16x128xf32>, vector<128x32xf32>, vector<16x32xf32> -> vector<16x32xf32>
    %20 = arith.addf %17, %19 : vector<16x32xf32>
    %c0_14 = arith.constant 0 : index
    %c0_15 = arith.constant 0 : index
    %21 = vector.load %arg11[%c0_14, %c0_15] : memref<16x32xf32, #tpu.memory_space<vmem>>, vector<16x32xf32>
    tpu.vector_store %arg11[%c0_14, %c0_15], %20 {strides = array<i32>} : memref<16x32xf32, #tpu.memory_space<vmem>>, vector<16x32xf32>,
    %c0_i32_16 = arith.constant 0 : i32
    %22 = arith.cmpi eq, %arg1, %c0_i32_16 : i32
    %23 = arith.extui %22 : i1 to i32
    %c0_i32_17 = arith.constant 0 : i32
    %24 = arith.cmpi ne, %23, %c0_i32_17 : i32
    scf.if %24 {
      %c0_18 = arith.constant 0 : index
      %c0_19 = arith.constant 0 : index
      %25 = vector.load %arg11[%c0_18, %c0_19] : memref<16x32xf32, #tpu.memory_space<vmem>>, vector<16x32xf32>
      %c0_20 = arith.constant 0 : index
      %c0_21 = arith.constant 0 : index
      %26 = vector.load %arg9[%c0_20, %c0_21] : memref<16x32xf32, #tpu.memory_space<vmem>>, vector<16x32xf32>
      tpu.vector_store %arg9[%c0_20, %c0_21], %25 {strides = array<i32>} : memref<16x32xf32, #tpu.memory_space<vmem>>, vector<16x32xf32>,
    } else {
    }
    return
  }
  func.func @transform_0(%arg0: i32, %arg1: i32) -> (i32, i32) {
    %c0_i32 = arith.constant 0 : i32
    %c0_i32_0 = arith.constant 0 : i32
    return %arg0, %c0_i32 : i32, i32
  }
  func.func @transform_1(%arg0: i32, %arg1: i32) -> (i32, i32) {
    %c0_i32 = arith.constant 0 : i32
    %c0_i32_0 = arith.constant 0 : i32
    %c0_i32_1 = arith.constant 0 : i32
    return %c0_i32, %c0_i32_0 : i32, i32
  }
  func.func @transform_2(%arg0: i32, %arg1: i32) -> (i32, i32) {
    %c0_i32 = arith.constant 0 : i32
    %c0_i32_0 = arith.constant 0 : i32
    %c0_i32_1 = arith.constant 0 : i32
    return %c0_i32, %c0_i32_0 : i32, i32
  }
  func.func @transform_3(%arg0: i32, %arg1: i32) -> (i32, i32) {
    %c0_i32 = arith.constant 0 : i32
    %c0_i32_0 = arith.constant 0 : i32
    return %c0_i32, %arg1 : i32, i32
  }
  func.func @transform_4(%arg0: i32, %arg1: i32) -> (i32, i32) {
    %c0_i32 = arith.constant 0 : i32
    %c0_i32_0 = arith.constant 0 : i32
    return %c0_i32, %arg1 : i32, i32
  }
  func.func @transform_5(%arg0: i32, %arg1: i32) -> (i32, i32) {
    %c0_i32 = arith.constant 0 : i32
    %c0_i32_0 = arith.constant 0 : i32
    return %arg1, %c0_i32 : i32, i32
  }
  func.func @transform_6(%arg0: i32, %arg1: i32) -> (i32, i32) {
    %c0_i32 = arith.constant 0 : i32
    %c0_i32_0 = arith.constant 0 : i32
    %c0_i32_1 = arith.constant 0 : i32
    return %c0_i32, %c0_i32_0 : i32, i32
  }
  func.func @transform_7(%arg0: i32, %arg1: i32) -> (i32, i32) {
    %c0_i32 = arith.constant 0 : i32
    %c0_i32_0 = arith.constant 0 : i32
    return %arg0, %c0_i32 : i32, i32
  }
}

</mosaic_0001>

<bundles_post_ra>
// kernel: _ffn_impl.1
= control target key start
LH: loop header
LB: loop body
LE: loop exit
PB: predicated region body
PF: predicated region fallthrough
CT: control target
= control target key end

     0   :  { %vm33_vm0 = vcmask 261120   ;;  %s613_s0 = inlined_call_operand.vmem [shape: f32[16,32], index: 0, kind: input, shape index: {}]   ;;  %s614_s1 = inlined_call_operand.vmem [shape: f32[1,32], index: 1, kind: input, shape index: {}]   ;;  %s615_s2 = inlined_call_operand.vmem [shape: f32[1,32], index: 2, kind: input, shape index: {}]   ;;  %s616_s3 = inlined_call_operand.vmem [shape: f32[32,128], index: 3, kind: input, shape index: {}]   ;;  %s617_s4 = inlined_call_operand.vmem [shape: f32[1,128], index: 4, kind: input, shape index: {}]   ;;  %s618_s5 = inlined_call_operand.vmem [shape: f32[128,32], index: 5, kind: input, shape index: {}]   ;;  %s619_s6 = inlined_call_operand.vmem [shape: f32[1,32], index: 6, kind: input, shape index: {}]   ;;  %s620_s7 = inlined_call_operand.hbm [shape: f32[16,32], index: 7, kind: output, shape index: {}]  }
   0x1   :  { %v31_v0 = vld [vmem:[%s613_s0] sm:$0xff]  ;;  %v32_v1 = vld [vmem:[%s613_s0 + $0x8] sm:$0xff] }
   0x2   :  { %12 = vsyncpa [#allocation5], 0  ;;  %v34_v2 = vsel %vm33_vm0, %v31_v0, 0.0  ;;  %v37_v3 = vsel %vm33_vm0, %v32_v1, 0.0  ;;  %v92_v14 = vld [vmem:[%s616_s3] sm:$0xff]  ;;  %v93_v15 = vld [vmem:[%s616_s3 + $0x8] sm:$0xff] }
   0x3   :  { %35 = vadd.xlane.f32.xlu0 %v34_v2  ;;  %v391_v16 = vpack.c.bf16 %v93_v15, %v92_v14  ;;  %v94_v17 = vld [vmem:[%s616_s3 + $0x10] sm:$0xff]  ;;  %v95_v18 = vld [vmem:[%s616_s3 + $0x18] sm:$0xff]  ;;  %v197_v20 = vld [vmem:[%s618_s5] sm:$0xff] }
   0x4   :  { %v395_v19 = vpack.c.bf16 %v95_v18, %v94_v17  ;;  %v198_v21 = vld [vmem:[%s618_s5 + $0x8] sm:$0xff]  ;;  %v199_v22 = vld [vmem:[%s618_s5 + $0x10] sm:$0xff]  ;;  %v200_v24 = vld [vmem:[%s618_s5 + $0x18] sm:$0xff] }
   0x5   :  { %392 = vmatprep.subr.bf16.mxu0 %v391_v16  ;;  %v399_v23 = vpack.c.bf16 %v198_v21, %v197_v20  ;;  %v403_v25 = vpack.c.bf16 %v200_v24, %v199_v22  ;;  %v201_v26 = vld [vmem:[%s618_s5 + $0x20] sm:$0xff]  ;;  %v202_v27 = vld [vmem:[%s618_s5 + $0x28] sm:$0xff]  ;;  %v203_v47 = vld [vmem:[%s618_s5 + $0x30] sm:$0xff] }
   0x6   :  { %394 = vmatpush3.bf16.msra.mxu0 %v391_v16  ;;  %v407_v28 = vpack.c.bf16 %v202_v27, %v201_v26  ;;  %v315_v36 = vld [vmem:[%s614_s1] ss:$0 sm:$0xff]  ;;  %v204_v48 = vld [vmem:[%s618_s5 + $0x38] sm:$0xff]  ;;  %v206_v51 = vld [vmem:[%s618_s5 + $0x48] sm:$0xff] }
   0x7   :  { %38 = vadd.xlane.f32.xlu0 %v37_v3  ;;  %396 = vmatprep.subr.bf16.mxu0 %v395_v19  ;;  %v316_v38 = vld [vmem:[%s615_s2] ss:$0 sm:$0xff]  ;;  %v411_v49 = vpack.c.bf16 %v204_v48, %v203_v47  ;;  %v207_v53 = vld [vmem:[%s618_s5 + $0x50] sm:$0xff]  ;;  %v208_v54 = vld [vmem:[%s618_s5 + $0x58] sm:$0xff] }
   0x8   :  { %400 = vmatprep.subr.bf16.mxu1 %v399_v23  ;;  %v205_v50 = vld [vmem:[%s618_s5 + $0x40] sm:$0xff]  ;;  %v419_v55 = vpack.c.bf16 %v208_v54, %v207_v53  ;;  %v210_v57 = vld [vmem:[%s618_s5 + $0x68] sm:$0xff]  ;;  %v211_v59 = vld [vmem:[%s618_s5 + $0x70] sm:$0xff] }
   0x9   :  { %402 = vmatpush3.bf16.msra.mxu1 %v399_v23  ;;  %v415_v52 = vpack.c.bf16 %v206_v51, %v205_v50  ;;  %v209_v56 = vld [vmem:[%s618_s5 + $0x60] sm:$0xff]  ;;  %v212_v60 = vld [vmem:[%s618_s5 + $0x78] sm:$0xff] }
   0xa   :  { %398 = vmatpush3.bf16.msra.mxu0 %v395_v19  ;;  %404 = vmatprep.subr.bf16.mxu1 %v403_v25  ;;  %v423_v58 = vpack.c.bf16 %v210_v57, %v209_v56  ;;  %v427_v61 = vpack.c.bf16 %v212_v60, %v211_v59  ;;  %v317_v62 = vld [vmem:[%s619_s6] ss:$0 sm:$0xff] }
   0xb   :  { %89 = vst.msk [vmem:[#allocation3 + $0x8] sm:$0xff] %vm33_vm0, %v317_v62  ;;  %88 = vst.msk [vmem:[#allocation3] sm:$0xff] %vm33_vm0, %v317_v62  ;;  %v318_v63 = vld [vmem:[%s617_s4] ss:$0 sm:$0xff]  ;;  %s466_s4 = smov [#allocation4]  }
   0xc   :  { %s304_s5 = sshll.u32 %s466_s4, 4  ;;  %s305_s5 = int_to_ptr.vmem [resolvable:$true] %s304_s5 }
   0xd   :  { %406 = vmatpush3.bf16.msra.mxu1 %v403_v25  ;;  %s442_s6 = scalar_lea.vmem %s305_s5, 256  ;;  %p447_p1 = scmp.lt.s32.totalorder %s305_s5, %s305_s5 }
   0xe   :  { %408 = vmatprep.subr.bf16.mxu1 %v407_v28  ;;  %p443_p0 = scmp.ne.s32.totalorder %s305_s5, %s442_s6  ;;  %p448_p2 = scmp.lt.s32.totalorder %s442_s6, %s442_s6 }
  0x10   :  { %p449_p3 = por %p448_p2, %p447_p1 }
  0x11   :  { %410 = vmatpush3.bf16.msra.mxu1 %v407_v28 }
  0x12   :  { %412 = vmatprep.subr.bf16.mxu1 %v411_v49  ;;  %v196_v14 = vld [vmem:[#allocation3 + $0x8] sm:$0xff]  ;;  %v195_v15 = vld [vmem:[#allocation3] sm:$0xff]  ;;  %p450_p4 = pnand %p449_p3, %p443_p0 }
  0x15   :  { %414 = vmatpush3.bf16.msra.mxu1 %v411_v49 }
  0x16   :  { %416 = vmatprep.subr.bf16.mxu1 %v415_v52 }
  0x19   :  { %418 = vmatpush3.bf16.msra.mxu1 %v415_v52 }
  0x1a   :  { %420 = vmatprep.subr.bf16.mxu1 %v419_v55 }
  0x1d   :  { %422 = vmatpush3.bf16.msra.mxu1 %v419_v55 }
  0x1e   :  { %424 = vmatprep.subr.bf16.mxu1 %v423_v58 }
  0x21   :  { %426 = vmatpush3.bf16.msra.mxu1 %v423_v58 }
  0x22   :  { %428 = vmatprep.subr.bf16.mxu1 %v427_v61 }
  0x25   :  { %430 = vmatpush3.bf16.msra.mxu1 %v427_v61 }
  0x90   :  { %v36_v4 = vpop.xlane.xlu0 %35 }
  0x91   :  { %v41_v5 = vmul.f32 0.03125, %v36_v4 }
  0x93   :  { %v43_v6 = vsub.f32 %v31_v0, %v41_v5 }
  0x94   :  { %v39_v7 = vpop.xlane.xlu0 %38 }
  0x95   :  { %v42_v8 = vmul.f32 0.03125, %v39_v7  ;;  %v45_v9 = vmul.f32 %v43_v6, %v43_v6 }
  0x97   :  { %v44_v10 = vsub.f32 %v32_v1, %v42_v8  ;;  %v47_v11 = vsel %vm33_vm0, %v45_v9, 0.0 }
  0x98   :  { %48 = vadd.xlane.f32.xlu1 %v47_v11 }
  0x99   :  { %v46_v12 = vmul.f32 %v44_v10, %v44_v10 }
  0x9b   :  { %v50_v13 = vsel %vm33_vm0, %v46_v12, 0.0 }
  0x9c   :  { %51 = vadd.xlane.f32.xlu1 %v50_v13 }
 0x125   :  { %v49_v29 = vpop.xlane.xlu1 %48 }
 0x126   :  { %v53_v30 = vmul.f32 0.03125, %v49_v29 }
 0x128   :  { %v55_v31 = vadd.f32 1e-05, %v53_v30 }
 0x129   :  { %v52_v32 = vpop.xlane.xlu1 %51 }
 0x12a   :  { %434 = vrsqrt.f32 %v55_v31  ;;  %v54_v33 = vmul.f32 0.03125, %v52_v32 }
 0x12c   :  { %v56_v34 = vadd.f32 1e-05, %v54_v33 }
 0x12e   :  { %436 = vrsqrt.f32 %v56_v34 }
 0x134   :  { %v435_v35 = vpop.eup %434 }
 0x135   :  { %v59_v37 = vmul.f32 %v435_v35, %v43_v6 }
 0x137   :  { %v68_v39 = vmul.f32 %v315_v36, %v59_v37 }
 0x138   :  { %v437_v40 = vpop.eup %436 }
 0x139   :  { %v77_v41 = vadd.f32 %v316_v38, %v68_v39  ;;  %v60_v42 = vmul.f32 %v437_v40, %v44_v10 }
 0x13b   :  { %79 = vst.msk [vmem:[#allocation2] sm:$0xff] %vm33_vm0, %v77_v41  ;;  %v69_v43 = vmul.f32 %v315_v36, %v60_v42 }
 0x13d   :  { %v78_v44 = vadd.f32 %v316_v38, %v69_v43 }
 0x13f   :  { %80 = vst.msk [vmem:[#allocation2 + $0x8] sm:$0xff] %vm33_vm0, %v78_v44 }
 0x142   :  { %v90_v45 = vld [vmem:[#allocation2] sm:$0xff] }
 0x143   :  { %353 = vmatprep.mubr.msk.f32.mxu0 %vm33_vm0, %v90_v45 }
 0x146   :  { %v91_v46 = vld [vmem:[#allocation2 + $0x8] sm:$0xff] }
 0x147   :  { %354 = vmatmul.mubr.msk.f32.vlgmr.msra.gmra.mrb[0].mxu0 %vm33_vm0, %v91_v46 }
 0x21a   :  { %v355_v0 = vpop.f32.mrb[0].mxu0 }
 0x21b   :  { %v182_v1 = vadd.f32 %v355_v0, %v318_v63  ;;  %v176_v2 = vpop.f32.mrb[1].mxu0 }
 0x21c   :  { %v177_v3 = vadd.f32 %v318_v63, %v176_v2 }
 0x21d   :  { %v188_v4 = vmul.f32 0.70710677, %v182_v1  ;;  %v186_v11 = vmul.f32 0.5, %v182_v1 }
 0x21e   :  { %v187_v5 = vmul.f32 0.70710677, %v177_v3  ;;  %v185_v9 = vmul.f32 0.5, %v177_v3 }
 0x21f   :  { %438 = verf.f32 %v188_v4 }
 0x220   :  { %440 = verf.f32 %v187_v5 }
 0x229   :  { %v439_v6 = vpop.eup %438 }
 0x22a   :  { %v441_v7 = vpop.eup %440  ;;  %v192_v8 = vadd.f32 1.0, %v439_v6 }
 0x22b   :  { %v191_v10 = vadd.f32 1.0, %v441_v7 }
 0x22c   :  { %v194_v13 = vmul.f32 %v192_v8, %v186_v11 }
 0x22d   :  { %v193_v12 = vmul.f32 %v191_v10, %v185_v9 }
 0x22f   :  { %388 = vmatprep.mubr.f32.mxu1 %v193_v12 }
 0x230   :  { %389 = vmatmul.mubr.f32.vlgmr.msra.gmra.mrb[0].mxu1 %v194_v13 }
 0x303   :  { %v390_v16 = vpop.f32.mrb[0].mxu1 }
 0x304   :  { %v289_v17 = vadd.f32 %v390_v16, %v196_v14  ;;  %v279_v18 = vpop.f32.mrb[1].mxu1 }
 0x305   :  { %v288_v19 = vadd.f32 %v279_v18, %v195_v15 }
 0x306   :  { %291 = vst.msk [vmem:[#allocation3 + $0x8] sm:$0xff] %vm33_vm0, %v289_v17 }
 0x307   :  { %290 = vst.msk [vmem:[#allocation3] sm:$0xff] %vm33_vm0, %v288_v19 }
 0x30d   :  { %v296_v20 = vld [vmem:[#allocation3 + $0x8] sm:$0xff] }
 0x30e   :  { %v295_v21 = vld [vmem:[#allocation3] sm:$0xff]  ;;  %298 = vst.msk [vmem:[#allocation4 + $0x8] sm:$0xff] %vm33_vm0, %v296_v20 }
 0x30f   :  { %297 = vst.msk [vmem:[#allocation4] sm:$0xff] %vm33_vm0, %v295_v21 }
 0x310   :  { %453 = shalt.err (!%p450_p4)
}
 0x311   :  { %s454_s26 = scalar_lea.hbm %s620_s7, 256 }
 0x312   :  { %p455_p5 = scmp.ne.s32.totalorder %s620_s7, %s454_s26  ;;  %p458_p6 = scmp.lt.u32.totalorder %s454_s26, %s620_s7 }
 0x314   :  { %p460_p7 = pnand %p458_p6, %p455_p5 }
 0x316   :  { %463 = shalt.err (!%p460_p7)
}
 0x317   :  { %s467_s28 = smov 128   ;;  %s468_s29 = smov 8  }
 0x318   :  { %310 = dma.vmem_to_hbm [thread:$0]  %s305_s5, 256, %s620_s7, [#allocation5], %s467_s28, %s467_s28, %s468_s29  }
 0x319   :  { %464 = dma.done.wait [#allocation5], 256  }
 0x31a   :  { %465 = vsyncadd [#allocation5], 4294967040 }
 0x31b   :  { %314 = vsyncpa [#allocation5], 1 }

</bundles_post_ra>
